<compile_context>
chip_gen: v6e
topology: v6e:2x2x1
jax: 0.10.0
libtpu: 0.0.40
codegen_flags: <defaults>
</compile_context>

<pallas_src>
import functools

import jax
import jax.numpy as jnp
from jax.experimental import pallas as pl
from jax.experimental.pallas import tpu as pltpu

WINDOW_SIZE = 10
H1 = 5
H2 = 2
_LANE = 128  # TPU lane width; batch tiles are multiples of this.


def _ae_kernel(x_ref,
               w1_ref, b1_ref,
               w2_ref, b2_ref,
               w3_ref, b3_ref,
               w4_ref, b4_ref,
               o_ref):
    # Activations are (features, tile_B): batch lives on the 128-wide lane axis.
    x = x_ref[...]                                                            # (10, tile_B)

    # encoder
    h = jnp.dot(w1_ref[...], x, preferred_element_type=jnp.float32) + b1_ref[...]
    h = jnp.maximum(h, 0.0)                                                   # (5, tile_B)
    z = jnp.dot(w2_ref[...], h, preferred_element_type=jnp.float32) + b2_ref[...]
    z = jnp.maximum(z, 0.0)                                                   # (2, tile_B)

    # decoder
    d = jnp.dot(w3_ref[...], z, preferred_element_type=jnp.float32) + b3_ref[...]
    d = jnp.maximum(d, 0.0)                                                   # (5, tile_B)
    y = jnp.dot(w4_ref[...], d, preferred_element_type=jnp.float32) + b4_ref[...]
    y = jnp.maximum(y, 0.0)                                                   # (10, tile_B)

    o_ref[...] = y


def _round_up(n, m):
    return ((n + m - 1) // m) * m


def _chip_config():
    """Generation-aware (max_tile_lanes, vmem_limit_bytes, dimension_semantics)."""
    try:
        kind = jax.devices()[0].device_kind.lower()
    except Exception:  # pragma: no cover - defensive
        kind = ""
    if "v7" in kind:
        # 64 MiB VMEM per TC, 3.2 TB/s HBM: big tiles sized to the per-TC budget,
        # and ask for core-level sharding of the batch axis across both TCs.
        return 65536, 48 << 20, "core_parallel"
    if "v6" in kind or "trillium" in kind:
        return 65536, 64 << 20, "parallel"
    if "v5e" in kind or "v5 lite" in kind or "v5lite" in kind:
        # ~820 GB/s HBM: 32K lanes already amortizes the per-step overhead ~10x.
        return 32768, 64 << 20, "parallel"
    # v4 / v5p / unknown: conservative but still >60x larger than the old 512-lane tile.
    return 32768, 48 << 20, "parallel"


@functools.partial(jax.jit, static_argnames=("tile", "semantics", "vmem_limit_bytes"))
def _forward_fm_impl(xt, params, *, tile, semantics, vmem_limit_bytes):
    """xt: (WINDOW_SIZE, padded_B) feature-major, padded_B a multiple of 128."""
    w1, b1, w2, b2, w3, b3, w4, b4 = params
    feat, batch = xt.shape
    out_feat = w4.shape[0]

    grid = (pl.cdiv(batch, tile),)  # ragged final tile is masked by Pallas

    def act_spec(rows):
        return pl.BlockSpec((rows, tile), lambda i: (0, i))

    def resident_spec(a):
        # Full-array block, constant block index -> stays VMEM-resident across grid steps.
        return pl.BlockSpec(a.shape, lambda i: (0, 0))

    if semantics == "core_parallel":
        dim_sem = (getattr(pltpu, "CORE_PARALLEL", "parallel"),)
    else:
        dim_sem = ("parallel",)

    return pl.pallas_call(
        _ae_kernel,
        out_shape=jax.ShapeDtypeStruct((out_feat, batch), xt.dtype),
        grid=grid,
        in_specs=[
            act_spec(feat),
            resident_spec(w1), resident_spec(b1),
            resident_spec(w2), resident_spec(b2),
            resident_spec(w3), resident_spec(b3),
            resident_spec(w4), resident_spec(b4),
        ],
        out_specs=act_spec(out_feat),
        compiler_params=pltpu.CompilerParams(
            dimension_semantics=dim_sem,
            vmem_limit_bytes=vmem_limit_bytes,
        ),
    )(xt, w1, b1, w2, b2, w3, b3, w4, b4)


def autoencoder_forward_fm(xt, params, *, tile_b=None):
    """Feature-major forward (preferred): xt is (WINDOW_SIZE, B) -> (WINDOW_SIZE, B).

    No wrapper transposes; at most a 128-lane pad when B % 128 != 0."""
    feat, batch = xt.shape
    max_tile, vmem_limit, semantics = _chip_config()
    if tile_b is not None:
        max_tile = max(_LANE, _round_up(int(tile_b), _LANE))

    padded_b = _round_up(max(batch, 1), _LANE)      # pad only to 128 lanes, never to the tile
    tile = min(max_tile, padded_b)

    xt_in = xt if padded_b == batch else jnp.pad(xt, ((0, 0), (0, padded_b - batch)))

    try:
        out = _forward_fm_impl(xt_in, params, tile=tile, semantics=semantics,
                               vmem_limit_bytes=vmem_limit)
    except Exception:
        if semantics == "parallel":
            raise
        # Fall back if core-level sharding is unavailable on this runtime.
        out = _forward_fm_impl(xt_in, params, tile=tile, semantics="parallel",
                               vmem_limit_bytes=vmem_limit)

    return out if padded_b == batch else out[:, :batch]


def autoencoder_forward(x, params, *, tile_b=None):
    """PyTorch-layout wrapper: x (B, WINDOW_SIZE) -> (B, WINDOW_SIZE).

    The two transposes are extra full HBM passes; prefer `autoencoder_forward_fm`
    when the surrounding pipeline can stay feature-major."""
    return autoencoder_forward_fm(x.T, params, tile_b=tile_b).T


def init_params(key):
    """Deterministic init mimicking PyTorch Linear's U(-1/sqrt(fan_in), +1/sqrt(fan_in)).
    Weights in PyTorch (out, in) layout; biases as (out, 1) for lane-broadcast in-kernel."""
    dims = [(H1, WINDOW_SIZE), (H2, H1), (H1, H2), (WINDOW_SIZE, H1)]
    params = []
    for (fan_out, fan_in) in dims:
        key, kw, kb = jax.random.split(key, 3)
        bound = 1.0 / jnp.sqrt(float(fan_in))
        w = jax.random.uniform(kw, (fan_out, fan_in), jnp.float32, -bound, bound)
        b = jax.random.uniform(kb, (fan_out, 1), jnp.float32, -bound, bound)
        params += [w, b]
    return tuple(params)


def _reference_forward(x, params):
    """Pure-JAX reference matching PyTorch nn.Linear semantics: y = x @ W^T + b."""
    w1, b1, w2, b2, w3, b3, w4, b4 = params
    h = jax.nn.relu(x @ w1.T + b1.T)
    z = jax.nn.relu(h @ w2.T + b2.T)
    d = jax.nn.relu(z @ w3.T + b3.T)
    return jax.nn.relu(d @ w4.T + b4.T)


if __name__ == "__main__":
    key = jax.random.PRNGKey(0)
    key, kx_small, kx_big, kx_rag = jax.random.split(key, 4)
    params = init_params(key)

    # 1) Tiny batch through the PyTorch-layout wrapper (single 128-lane tile).
    x_small = jax.random.normal(kx_small, (8, WINDOW_SIZE), jnp.float32)
    out_small = jax.block_until_ready(autoencoder_forward(x_small, params))
    assert out_small.shape == (8, WINDOW_SIZE)
    assert jnp.allclose(out_small, _reference_forward(x_small, params), atol=1e-5, rtol=1e-5)

    # 2) Feature-major path (no wrapper transposes), multi-step pipelined grid.
    x_big = jax.random.normal(kx_big, (WINDOW_SIZE, 300), jnp.float32)
    out_big = jax.block_until_ready(autoencoder_forward_fm(x_big, params, tile_b=128))
    assert out_big.shape == (WINDOW_SIZE, 300)
    ref_big = _reference_forward(x_big.T, params).T
    assert jnp.allclose(out_big, ref_big, atol=1e-5, rtol=1e-5)

    # 3) Ragged final tile: tile (256) does not divide the padded batch (384);
    #    Pallas masks the out-of-bounds columns of the last block.
    x_rag = jax.random.normal(kx_rag, (WINDOW_SIZE, 300), jnp.float32)
    out_rag = jax.block_until_ready(autoencoder_forward_fm(x_rag, params, tile_b=256))
    assert out_rag.shape == (WINDOW_SIZE, 300)
    ref_rag = _reference_forward(x_rag.T, params).T
    assert jnp.allclose(out_rag, ref_rag, atol=1e-5, rtol=1e-5)

    print("KERNEL_OK")
</pallas_src>

<mosaic_0001>
module attributes {stable_mosaic.version = 11 : i64} {
  func.func @_ae_kernel(%arg0: i32, %arg1: memref<10x128xf32, #tpu.memory_space<vmem>>, %arg2: memref<5x10xf32, #tpu.memory_space<vmem>>, %arg3: memref<5x1xf32, #tpu.memory_space<vmem>>, %arg4: memref<2x5xf32, #tpu.memory_space<vmem>>, %arg5: memref<2x1xf32, #tpu.memory_space<vmem>>, %arg6: memref<5x2xf32, #tpu.memory_space<vmem>>, %arg7: memref<5x1xf32, #tpu.memory_space<vmem>>, %arg8: memref<10x5xf32, #tpu.memory_space<vmem>>, %arg9: memref<10x1xf32, #tpu.memory_space<vmem>>, %arg10: memref<10x128xf32, #tpu.memory_space<vmem>>) attributes {dimension_semantics = [#tpu.dimension_semantics<parallel>], iteration_bounds = array<i64: 1>, scalar_prefetch = 0 : i64, scratch_operands = 0 : i64, tpu.core_type = #tpu.core_type<tc>, window_params = [{transform_indices = @transform_0, window_bounds = array<i64: 10, 128>}, {pipeline_mode = #tpu.pipeline_mode<synchronous>, transform_indices = @transform_1, window_bounds = array<i64: 5, 10>}, {pipeline_mode = #tpu.pipeline_mode<synchronous>, transform_indices = @transform_2, window_bounds = array<i64: 5, 1>}, {pipeline_mode = #tpu.pipeline_mode<synchronous>, transform_indices = @transform_3, window_bounds = array<i64: 2, 5>}, {pipeline_mode = #tpu.pipeline_mode<synchronous>, transform_indices = @transform_4, window_bounds = array<i64: 2, 1>}, {pipeline_mode = #tpu.pipeline_mode<synchronous>, transform_indices = @transform_5, window_bounds = array<i64: 5, 2>}, {pipeline_mode = #tpu.pipeline_mode<synchronous>, transform_indices = @transform_6, window_bounds = array<i64: 5, 1>}, {pipeline_mode = #tpu.pipeline_mode<synchronous>, transform_indices = @transform_7, window_bounds = array<i64: 10, 5>}, {pipeline_mode = #tpu.pipeline_mode<synchronous>, transform_indices = @transform_8, window_bounds = array<i64: 10, 1>}, {transform_indices = @transform_9, window_bounds = array<i64: 10, 128>}]} {
    %c0 = arith.constant 0 : index
    %c0_0 = arith.constant 0 : index
    %0 = vector.load %arg1[%c0, %c0_0] : memref<10x128xf32, #tpu.memory_space<vmem>>, vector<10x128xf32>
    %c0_1 = arith.constant 0 : index
    %c0_2 = arith.constant 0 : index
    %1 = vector.load %arg2[%c0_1, %c0_2] : memref<5x10xf32, #tpu.memory_space<vmem>>, vector<5x10xf32>
    %cst = arith.constant dense<0.000000e+00> : vector<5x128xf32>
    %2 = tpu.matmul %1, %0, %cst {dimension_numbers = #tpu.dot_dimension_numbers<[1], [0], [0], [1], [0, 0, 1, 1], [], []>} : vector<5x10xf32>, vector<10x128xf32>, vector<5x128xf32> -> vector<5x128xf32>
    %c0_3 = arith.constant 0 : index
    %c0_4 = arith.constant 0 : index
    %3 = vector.load %arg3[%c0_3, %c0_4] : memref<5x1xf32, #tpu.memory_space<vmem>>, vector<5x1xf32>
    %4 = vector.broadcast %3 : vector<5x1xf32> to vector<5x128xf32>
    %5 = arith.addf %2, %4 : vector<5x128xf32>
    %cst_5 = arith.constant 0.000000e+00 : f32
    %6 = vector.broadcast %cst_5 : f32 to vector<5x128xf32>
    %7 = arith.maximumf %5, %6 : vector<5x128xf32>
    %c0_6 = arith.constant 0 : index
    %c0_7 = arith.constant 0 : index
    %8 = vector.load %arg4[%c0_6, %c0_7] : memref<2x5xf32, #tpu.memory_space<vmem>>, vector<2x5xf32>
    %cst_8 = arith.constant dense<0.000000e+00> : vector<2x128xf32>
    %9 = tpu.matmul %8, %7, %cst_8 {dimension_numbers = #tpu.dot_dimension_numbers<[1], [0], [0], [1], [0, 0, 1, 1], [], []>} : vector<2x5xf32>, vector<5x128xf32>, vector<2x128xf32> -> vector<2x128xf32>
    %c0_9 = arith.constant 0 : index
    %c0_10 = arith.constant 0 : index
    %10 = vector.load %arg5[%c0_9, %c0_10] : memref<2x1xf32, #tpu.memory_space<vmem>>, vector<2x1xf32>
    %11 = vector.broadcast %10 : vector<2x1xf32> to vector<2x128xf32>
    %12 = arith.addf %9, %11 : vector<2x128xf32>
    %cst_11 = arith.constant 0.000000e+00 : f32
    %13 = vector.broadcast %cst_11 : f32 to vector<2x128xf32>
    %14 = arith.maximumf %12, %13 : vector<2x128xf32>
    %c0_12 = arith.constant 0 : index
    %c0_13 = arith.constant 0 : index
    %15 = vector.load %arg6[%c0_12, %c0_13] : memref<5x2xf32, #tpu.memory_space<vmem>>, vector<5x2xf32>
    %cst_14 = arith.constant dense<0.000000e+00> : vector<5x128xf32>
    %16 = tpu.matmul %15, %14, %cst_14 {dimension_numbers = #tpu.dot_dimension_numbers<[1], [0], [0], [1], [0, 0, 1, 1], [], []>} : vector<5x2xf32>, vector<2x128xf32>, vector<5x128xf32> -> vector<5x128xf32>
    %c0_15 = arith.constant 0 : index
    %c0_16 = arith.constant 0 : index
    %17 = vector.load %arg7[%c0_15, %c0_16] : memref<5x1xf32, #tpu.memory_space<vmem>>, vector<5x1xf32>
    %18 = vector.broadcast %17 : vector<5x1xf32> to vector<5x128xf32>
    %19 = arith.addf %16, %18 : vector<5x128xf32>
    %cst_17 = arith.constant 0.000000e+00 : f32
    %20 = vector.broadcast %cst_17 : f32 to vector<5x128xf32>
    %21 = arith.maximumf %19, %20 : vector<5x128xf32>
    %c0_18 = arith.constant 0 : index
    %c0_19 = arith.constant 0 : index
    %22 = vector.load %arg8[%c0_18, %c0_19] : memref<10x5xf32, #tpu.memory_space<vmem>>, vector<10x5xf32>
    %cst_20 = arith.constant dense<0.000000e+00> : vector<10x128xf32>
    %23 = tpu.matmul %22, %21, %cst_20 {dimension_numbers = #tpu.dot_dimension_numbers<[1], [0], [0], [1], [0, 0, 1, 1], [], []>} : vector<10x5xf32>, vector<5x128xf32>, vector<10x128xf32> -> vector<10x128xf32>
    %c0_21 = arith.constant 0 : index
    %c0_22 = arith.constant 0 : index
    %24 = vector.load %arg9[%c0_21, %c0_22] : memref<10x1xf32, #tpu.memory_space<vmem>>, vector<10x1xf32>
    %25 = vector.broadcast %24 : vector<10x1xf32> to vector<10x128xf32>
    %26 = arith.addf %23, %25 : vector<10x128xf32>
    %cst_23 = arith.constant 0.000000e+00 : f32
    %27 = vector.broadcast %cst_23 : f32 to vector<10x128xf32>
    %28 = arith.maximumf %26, %27 : vector<10x128xf32>
    %c0_24 = arith.constant 0 : index
    %c0_25 = arith.constant 0 : index
    %29 = vector.load %arg10[%c0_24, %c0_25] : memref<10x128xf32, #tpu.memory_space<vmem>>, vector<10x128xf32>
    tpu.vector_store %arg10[%c0_24, %c0_25], %28 {strides = array<i32>} : memref<10x128xf32, #tpu.memory_space<vmem>>, vector<10x128xf32>,
    return
  }
  func.func @transform_0(%arg0: i32) -> (i32, i32) {
    %c0_i32 = arith.constant 0 : i32
    %c0_i32_0 = arith.constant 0 : i32
    return %c0_i32, %arg0 : i32, i32
  }
  func.func @transform_1(%arg0: i32) -> (i32, i32) {
    %c0_i32 = arith.constant 0 : i32
    %c0_i32_0 = arith.constant 0 : i32
    %c0_i32_1 = arith.constant 0 : i32
    return %c0_i32, %c0_i32_0 : i32, i32
  }
  func.func @transform_2(%arg0: i32) -> (i32, i32) {
    %c0_i32 = arith.constant 0 : i32
    %c0_i32_0 = arith.constant 0 : i32
    %c0_i32_1 = arith.constant 0 : i32
    return %c0_i32, %c0_i32_0 : i32, i32
  }
  func.func @transform_3(%arg0: i32) -> (i32, i32) {
    %c0_i32 = arith.constant 0 : i32
    %c0_i32_0 = arith.constant 0 : i32
    %c0_i32_1 = arith.constant 0 : i32
    return %c0_i32, %c0_i32_0 : i32, i32
  }
  func.func @transform_4(%arg0: i32) -> (i32, i32) {
    %c0_i32 = arith.constant 0 : i32
    %c0_i32_0 = arith.constant 0 : i32
    %c0_i32_1 = arith.constant 0 : i32
    return %c0_i32, %c0_i32_0 : i32, i32
  }
  func.func @transform_5(%arg0: i32) -> (i32, i32) {
    %c0_i32 = arith.constant 0 : i32
    %c0_i32_0 = arith.constant 0 : i32
    %c0_i32_1 = arith.constant 0 : i32
    return %c0_i32, %c0_i32_0 : i32, i32
  }
  func.func @transform_6(%arg0: i32) -> (i32, i32) {
    %c0_i32 = arith.constant 0 : i32
    %c0_i32_0 = arith.constant 0 : i32
    %c0_i32_1 = arith.constant 0 : i32
    return %c0_i32, %c0_i32_0 : i32, i32
  }
  func.func @transform_7(%arg0: i32) -> (i32, i32) {
    %c0_i32 = arith.constant 0 : i32
    %c0_i32_0 = arith.constant 0 : i32
    %c0_i32_1 = arith.constant 0 : i32
    return %c0_i32, %c0_i32_0 : i32, i32
  }
  func.func @transform_8(%arg0: i32) -> (i32, i32) {
    %c0_i32 = arith.constant 0 : i32
    %c0_i32_0 = arith.constant 0 : i32
    %c0_i32_1 = arith.constant 0 : i32
    return %c0_i32, %c0_i32_0 : i32, i32
  }
  func.func @transform_9(%arg0: i32) -> (i32, i32) {
    %c0_i32 = arith.constant 0 : i32
    %c0_i32_0 = arith.constant 0 : i32
    return %c0_i32, %arg0 : i32, i32
  }
}

</mosaic_0001>

<bundles_post_ra>
// kernel: _forward_fm_impl.1
= control target key start
LH: loop header
LB: loop body
LE: loop exit
PB: predicated region body
PF: predicated region fallthrough
CT: control target
= control target key end

     0   :  { %vm46_vm0 = vcmask 1041408   ;;  %v481_v1 = vmov 0.0   ;;  %vm482_vm1 = vmmov 0   ;;  %vm42_vm2 = vcmask 80896   ;;  %s587_s0 = inlined_call_operand.vmem [shape: f32[10,128], index: 0, kind: input, shape index: {}]   ;;  %s588_s1 = inlined_call_operand.vmem [shape: f32[5,10], index: 1, kind: input, shape index: {}]   ;;  %s589_s2 = inlined_call_operand.vmem [shape: f32[5,1], index: 2, kind: input, shape index: {}]   ;;  %s590_s3 = inlined_call_operand.vmem [shape: f32[2,5], index: 3, kind: input, shape index: {}]   ;;  %s591_s4 = inlined_call_operand.vmem [shape: f32[2,1], index: 4, kind: input, shape index: {}]   ;;  %s592_s5 = inlined_call_operand.vmem [shape: f32[5,2], index: 5, kind: input, shape index: {}]   ;;  %s593_s6 = inlined_call_operand.vmem [shape: f32[5,1], index: 6, kind: input, shape index: {}]   ;;  %s594_s7 = inlined_call_operand.vmem [shape: f32[10,5], index: 7, kind: input, shape index: {}]   ;;  %s595_s8 = inlined_call_operand.vmem [shape: f32[10,1], index: 8, kind: input, shape index: {}]   ;;  %s596_s9 = inlined_call_operand.hbm [shape: f32[10,128], index: 9, kind: output, shape index: {}]  }
   0x1   :  { %v34_v0 = vld [vmem:[%s587_s0 + $0x8] sm:$0x3]  ;;  %429 = vmatprep.subr.mxu0 %v481_v1  ;;  %v33_v2 = vld [vmem:[%s587_s0] sm:$0xff]  ;;  %433 = vmatprep.mubr.msk.f32.mxu0 %vm482_vm1, %v481_v1  ;;  %v483_v5 = vmov 0  }
   0x2   :  { %v36_v3 = vld [vmem:[%s589_s2] sm:$0x1f]  ;;  %430 = vmatpush3.msk.msra.mxu0 %vm46_vm0, %v34_v0  ;;  %457 = vset.pattern.permute.xlu0 %v483_v5 }
   0x3   :  { %v35_v4 = vld [vmem:[%s588_s1] sm:$0x1f] }
   0x4   :  { %14 = vsyncpa [#allocation3], 0  ;;  %431 = vmatprep.subr.mxu0 %v481_v1  ;;  %39 = vperm.xlu0 %457, %v36_v3   ;;  %v122_v6 = vld [vmem:[%s591_s4] sm:$0x3]  ;;  %v295_v7 = vld [vmem:[%s595_s8 + $0x8] sm:$0x3] }
   0x5   :  { %432 = vmatpush3.msra.mxu0 %v33_v2  ;;  %436 = vmatprep.subr.mxu1 %v481_v1  ;;  %vm132_vm3 = vcmask 1044480   ;;  %v121_v13 = vld [vmem:[%s590_s3] sm:$0x3]  ;;  %vm128_vm4 = vcmask 39936   ;;  %vm214_vm5 = vcmask 15360  }
   0x6   :  { %434 = vmatmul.mubr.msk.f32.vlgmr.msra.gmra.mxu0 %vm42_vm2, %v35_v4  ;;  %438 = vmatprep.mubr.msk.f32.mxu1 %vm482_vm1, %v481_v1  ;;  %v208_v14 = vld [vmem:[%s593_s6] sm:$0x1f]  ;;  %v293_v28 = vld [vmem:[%s594_s7 + $0x8] sm:$0x3] }
   0x7   :  { %458 = vset.pattern.permute.xlu1 %v483_v5  ;;  %v294_v15 = vld [vmem:[%s595_s8] sm:$0xff] }
   0x8   :  { %125 = vperm.xlu0 %457, %v122_v6   ;;  %211 = vperm.xlu1 %458, %v208_v14   ;;  %v207_v21 = vld [vmem:[%s592_s5] sm:$0x1f]  ;;  %s484_s5 = smov [#allocation2]  }
   0x9   :  { %v292_v22 = vld [vmem:[%s594_s7] sm:$0xff]  ;;  %s399_s26 = sshll.u32 %s484_s5, 4  ;;  %s400_s26 = int_to_ptr.vmem [resolvable:$true] %s399_s26 }
   0xa   :  { %448 = vmatprep.mubr.msk.f32.mxu0 %vm128_vm4, %v292_v22  ;;  %s459_s7 = scalar_lea.vmem %s400_s26, 256  ;;  %p464_p1 = scmp.lt.s32.totalorder %s400_s26, %s400_s26 }
   0xb   :  { %p460_p0 = scmp.ne.s32.totalorder %s400_s26, %s459_s7  ;;  %p465_p2 = scmp.lt.s32.totalorder %s459_s7, %s459_s7 }
   0xc   :  { %303 = vperm.xlu0 %457, %v295_v7   ;;  %298 = vperm.xlu1 %458, %v294_v15  }
   0xd   :  { %p466_p3 = por %p465_p2, %p464_p1 }
   0xf   :  { %p467_p4 = pnand %p466_p3, %p460_p0 }
  0x7f   :  { %v40_v8 = vpop.permute.xlu0 %39 }
  0x83   :  { %v126_v16 = vpop.permute.xlu0 %125  ;;  %v212_v23 = vpop.permute.xlu1 %211 }
  0x87   :  { %v304_v29 = vpop.permute.xlu0 %303  ;;  %v299_v32 = vpop.permute.xlu1 %298 }
  0xc6   :  { %v116_v9 = vpop.f32.mrf.mxu0 }
  0xc7   :  { %v117_v10 = vadd.f32 %v116_v9, %v40_v8 }
  0xc8   :  { %v435_v11 = vpop.f32.mrf.mxu0 }
  0xc9   :  { %v120_v12 = vmax.f32 %v117_v10, 0.0 }
  0xcb   :  { %437 = vmatpush3.msk.msra.mxu1 %vm132_vm3, %v120_v12 }
  0xcc   :  { %439 = vmatmul.mubr.msk.f32.vlgmr.msra.gmra.mxu1 %vm128_vm4, %v121_v13  ;;  %441 = vmatprep.subr.mxu1 %v481_v1 }
  0xcd   :  { %443 = vmatprep.mubr.msk.f32.mxu1 %vm482_vm1, %v481_v1 }
 0x18c   :  { %v202_v17 = vpop.f32.mrf.mxu1 }
 0x18d   :  { %v203_v18 = vadd.f32 %v202_v17, %v126_v16 }
 0x18e   :  { %v440_v19 = vpop.f32.mrf.mxu1 }
 0x18f   :  { %v206_v20 = vmax.f32 %v203_v18, 0.0 }
 0x191   :  { %442 = vmatpush3.msk.msra.mxu1 %vm46_vm0, %v206_v20 }
 0x192   :  { %444 = vmatmul.mubr.msk.f32.vlgmr.msra.gmra.mxu1 %vm214_vm5, %v207_v21 }
 0x252   :  { %v287_v24 = vpop.f32.mrf.mxu1 }
 0x253   :  { %v288_v25 = vadd.f32 %v287_v24, %v212_v23 }
 0x254   :  { %v445_v26 = vpop.f32.mrf.mxu1 }
 0x255   :  { %v291_v27 = vmax.f32 %v288_v25, 0.0 }
 0x257   :  { %446 = vmatprep.subr.msk.mxu0 %vm132_vm3, %v291_v27 }
 0x258   :  { %447 = vmatpush3.msk.msra.mxu0 %vm132_vm3, %v291_v27 }
 0x259   :  { %449 = vmatmul.mubr.msk.f32.vlgmr.msra.gmra.mxu0 %vm128_vm4, %v293_v28 }
 0x319   :  { %v450_v30 = vpop.f32.mrf.mxu0 }
 0x31a   :  { %v387_v31 = vadd.f32 %v450_v30, %v304_v29 }
 0x31b   :  { %v381_v33 = vpop.f32.mrf.mxu0 }
 0x31c   :  { %v391_v34 = vmax.f32 %v387_v31, 0.0  ;;  %v382_v35 = vadd.f32 %v381_v33, %v299_v32 }
 0x31e   :  { %393 = vst [vmem:[#allocation2 + $0x8] sm:$0x3] %v391_v34  ;;  %v390_v36 = vmax.f32 %v382_v35, 0.0 }
 0x320   :  { %392 = vst [vmem:[#allocation2] sm:$0xff] %v390_v36 }
 0x321   :  { %470 = shalt.err (!%p467_p4)
}
 0x322   :  { %s485_s27 = smov 128   ;;  %s486_s28 = smov 8  }
 0x323   :  { %405 = dma.vmem_to_hbm [thread:$0]  %s400_s26, 256, %s596_s9, [#allocation3], %s485_s27, %s485_s27, %s486_s28  }
 0x324   :  { %479 = dma.done.wait [#allocation3], 256  }
 0x325   :  { %480 = vsyncadd [#allocation3], 4294967040 }
 0x326   :  { %409 = vsyncpa [#allocation3], 1 }

</bundles_post_ra>
